<compile_context>
chip_gen: v5e
topology: v5e:2x2
jax: 0.10.0
libtpu: 0.0.40
codegen_flags: <defaults>
</compile_context>

<pallas_src>
import functools

import jax
import jax.numpy as jnp
from jax.experimental import pallas as pl
from jax.experimental.pallas import tpu as pltpu

# --- model hyper-parameters (small, consistent with the module) ---
BATCH = 2
SEQ = 8        # n_steps
D_MODEL = 32
D_FFN = 64
N_HEADS = 4
D_K = 8
D_V = 8
EPS = 1e-6


def _layer_norm(h, gamma, beta):
    mean = jnp.mean(h, axis=-1, keepdims=True)
    var = jnp.mean((h - mean) ** 2, axis=-1, keepdims=True)
    # rsqrt goes to the EUP slot instead of a VALU divide/sqrt chain.
    return (h - mean) * jax.lax.rsqrt(var + EPS) * gamma + beta


def encoder_layer_kernel(x_ref,
                         wq_ref, wk_ref, wv_ref, wo_ref,
                         ln1_g_ref, ln1_b_ref,
                         w1_ref, b1_ref, w2_ref, b2_ref,
                         ln2_g_ref, ln2_b_ref,
                         out_ref, attn_ref, *, nb):
    """One grid step processes `nb` batch elements (nb is a static constant)."""
    x = x_ref[...].reshape(nb * SEQ, D_MODEL)            # (nb*S, D)
    scale = 1.0 / jnp.sqrt(jnp.float32(D_K))             # 1 / temperature, temperature = sqrt(d_k)

    # Full-width Q/K/V projections: one MXU matmul each (instead of per-head 32x8 slices).
    q_all = jnp.dot(x, wq_ref[...], preferred_element_type=jnp.float32)   # (nb*S, H*dk)
    k_all = jnp.dot(x, wk_ref[...], preferred_element_type=jnp.float32)   # (nb*S, H*dk)
    v_all = jnp.dot(x, wv_ref[...], preferred_element_type=jnp.float32)   # (nb*S, H*dv)

    head_outs = []   # per batch element: (S, H*dv), heads concatenated along lanes
    attn_rows = []   # per batch element: (H*S, S), heads stacked along sublanes
    for b in range(nb):                                   # static unrolled
        r0 = b * SEQ
        o_heads = []
        a_heads = []
        for h in range(N_HEADS):                          # static unrolled
            qh = q_all[r0:r0 + SEQ, h * D_K:(h + 1) * D_K]   # (S, dk)
            kh = k_all[r0:r0 + SEQ, h * D_K:(h + 1) * D_K]   # (S, dk)
            vh = v_all[r0:r0 + SEQ, h * D_V:(h + 1) * D_V]   # (S, dv)

            # scores = qh @ kh.T (contract on dk without an explicit transpose)
            scores = jax.lax.dot_general(
                qh, kh, (((1,), (1,)), ((), ())),
                preferred_element_type=jnp.float32) * scale          # (S, S)
            scores = scores - jnp.max(scores, axis=-1, keepdims=True)
            e = jnp.exp(scores)
            denom = jnp.sum(e, axis=-1, keepdims=True)
            # softmax over keys: divide replaced by EUP approximate reciprocal
            attn = e * pl.reciprocal(denom, approx=True)              # (S, S)
            a_heads.append(attn)
            o_heads.append(jnp.dot(attn, vh, preferred_element_type=jnp.float32))  # (S, dv)

        attn_rows.append(jnp.concatenate(a_heads, axis=0))    # (H*S, S)
        head_outs.append(jnp.concatenate(o_heads, axis=-1))   # (S, H*dv)  == concat_h(O_h)

    # Single store of the whole attention map block (instead of per-head partial stores).
    attn_all = jnp.concatenate(attn_rows, axis=0)              # (nb*H*S, S)
    attn_ref[...] = attn_all.reshape(nb, N_HEADS * SEQ, SEQ)

    # One output projection against the full fc weight: concat_h(O_h) @ Wo.
    o_all = jnp.concatenate(head_outs, axis=0)                 # (nb*S, H*dv)
    mha = jnp.dot(o_all, wo_ref[...], preferred_element_type=jnp.float32)   # (nb*S, D)

    # dropout (identity at eval) + residual + LayerNorm(eps=1e-6)
    h1 = _layer_norm(mha + x, ln1_g_ref[...], ln1_b_ref[...])

    # Position-wise FFN: relu(linear1) -> linear2 -> (dropout) -> +residual -> LayerNorm
    ff = jnp.dot(h1, w1_ref[...], preferred_element_type=jnp.float32) + b1_ref[...]
    ff = jnp.maximum(ff, 0.0)
    ff = jnp.dot(ff, w2_ref[...], preferred_element_type=jnp.float32) + b2_ref[...]
    h2 = _layer_norm(ff + h1, ln2_g_ref[...], ln2_b_ref[...])

    out_ref[...] = h2.reshape(nb, SEQ, D_MODEL)


def _default_batch_block(batch_size):
    """v7x has 2 TensorCores per chip -> keep one batch element per (parallel) grid step.
    v5e/v6e are single-TC -> collapse the whole batch into one program (grid overhead
    dominates at these shapes)."""
    try:
        kind = jax.devices()[0].device_kind.lower()
    except Exception:  # pragma: no cover - be safe about device query
        kind = ""
    if ("v7" in kind or "7x" in kind) and batch_size > 1 and batch_size % 2 == 0:
        return 1
    return batch_size


def transformer_encoder_layer(x, params, batch_block=None):
    """x: (B, S, D) float32. params: tuple of 12 weight arrays (see init_params)."""
    B, S, D = x.shape
    assert (S, D) == (SEQ, D_MODEL)
    if batch_block is None:
        batch_block = _default_batch_block(B)
    assert B % batch_block == 0
    nb = batch_block
    grid = (B // nb,)

    def const_spec(shape):
        return pl.BlockSpec(shape, lambda b: (0,) * len(shape))

    in_specs = [
        pl.BlockSpec((nb, S, D), lambda b: (b, 0, 0)),   # x: nb batch rows per step
        const_spec((D, N_HEADS * D_K)),                  # w_qs
        const_spec((D, N_HEADS * D_K)),                  # w_ks
        const_spec((D, N_HEADS * D_V)),                  # w_vs
        const_spec((N_HEADS * D_V, D)),                  # fc
        const_spec((1, D)), const_spec((1, D)),          # layer_norm 1 gamma/beta
        const_spec((D, D_FFN)), const_spec((1, D_FFN)),  # ffn linear_1 W/b
        const_spec((D_FFN, D)), const_spec((1, D)),      # ffn linear_2 W/b
        const_spec((1, D)), const_spec((1, D)),          # ffn layer_norm gamma/beta
    ]
    out_specs = (
        pl.BlockSpec((nb, S, D), lambda b: (b, 0, 0)),
        pl.BlockSpec((nb, N_HEADS * S, S), lambda b: (b, 0, 0)),
    )
    out_shape = (
        jax.ShapeDtypeStruct((B, S, D), jnp.float32),
        jax.ShapeDtypeStruct((B, N_HEADS * S, S), jnp.float32),
    )
    kernel = functools.partial(encoder_layer_kernel, nb=nb)
    out, attn_flat = pl.pallas_call(
        kernel,
        out_shape=out_shape,
        grid=grid,
        in_specs=in_specs,
        out_specs=out_specs,
        compiler_params=pltpu.CompilerParams(dimension_semantics=("parallel",)),
    )(x, *params)
    # Attention map is produced as (B, H*S, S) (single dense store in-kernel);
    # reshape back to the module's (B, H, S, S) layout in the wrapper.
    attn = attn_flat.reshape(B, N_HEADS, S, S)
    return out, attn


def init_params(key):
    """Deterministic synthetic parameters matching the nn.Module __init__ shapes.
    Linear weights stored as (in_features, out_features) so y = x @ W + b."""
    keys = jax.random.split(key, 8)
    s = 0.1
    wq = s * jax.random.normal(keys[0], (D_MODEL, N_HEADS * D_K), jnp.float32)
    wk = s * jax.random.normal(keys[1], (D_MODEL, N_HEADS * D_K), jnp.float32)
    wv = s * jax.random.normal(keys[2], (D_MODEL, N_HEADS * D_V), jnp.float32)
    wo = s * jax.random.normal(keys[3], (N_HEADS * D_V, D_MODEL), jnp.float32)
    ln1_g = jnp.ones((1, D_MODEL), jnp.float32)
    ln1_b = jnp.zeros((1, D_MODEL), jnp.float32)
    w1 = s * jax.random.normal(keys[4], (D_MODEL, D_FFN), jnp.float32)
    b1 = s * jax.random.normal(keys[5], (1, D_FFN), jnp.float32)
    w2 = s * jax.random.normal(keys[6], (D_FFN, D_MODEL), jnp.float32)
    b2 = s * jax.random.normal(keys[7], (1, D_MODEL), jnp.float32)
    ln2_g = jnp.ones((1, D_MODEL), jnp.float32)
    ln2_b = jnp.zeros((1, D_MODEL), jnp.float32)
    return (wq, wk, wv, wo, ln1_g, ln1_b, w1, b1, w2, b2, ln2_g, ln2_b)


def reference_jax(x, params):
    """Pure-JAX reference of the same forward pass, for a correctness check."""
    (wq, wk, wv, wo, ln1_g, ln1_b, w1, b1, w2, b2, ln2_g, ln2_b) = params
    B, S, D = x.shape

    def ln(h, g, b):
        m = jnp.mean(h, axis=-1, keepdims=True)
        v = jnp.mean((h - m) ** 2, axis=-1, keepdims=True)
        return (h - m) / jnp.sqrt(v + EPS) * g + b

    q = (x @ wq).reshape(B, S, N_HEADS, D_K).transpose(0, 2, 1, 3)
    k = (x @ wk).reshape(B, S, N_HEADS, D_K).transpose(0, 2, 1, 3)
    v = (x @ wv).reshape(B, S, N_HEADS, D_V).transpose(0, 2, 1, 3)
    scores = jnp.einsum("bhqd,bhkd->bhqk", q, k) / jnp.sqrt(jnp.float32(D_K))
    attn = jax.nn.softmax(scores, axis=-1)
    o = jnp.einsum("bhqk,bhkd->bhqd", attn, v).transpose(0, 2, 1, 3).reshape(B, S, -1)
    o = o @ wo
    h1 = ln(o + x, ln1_g, ln1_b)
    ff = jax.nn.relu(h1 @ w1 + b1) @ w2 + b2
    out = ln(ff + h1, ln2_g, ln2_b)
    return out, attn


if __name__ == "__main__":
    key = jax.random.PRNGKey(0)
    kx, kp = jax.random.split(key)
    x = jax.random.normal(kx, (BATCH, SEQ, D_MODEL), jnp.float32)
    params = init_params(kp)

    enc_out, attn_w = transformer_encoder_layer(x, params)
    enc_out = jax.block_until_ready(enc_out)
    attn_w = jax.block_until_ready(attn_w)

    ref_out, ref_attn = reference_jax(x, params)
    assert enc_out.shape == (BATCH, SEQ, D_MODEL)
    assert attn_w.shape == (BATCH, N_HEADS, SEQ, SEQ)
    # Tolerance slightly relaxed vs exact math because the softmax denominator uses the
    # EUP approximate reciprocal (pl.reciprocal(approx=True)).
    assert jnp.allclose(enc_out, ref_out, atol=5e-3, rtol=5e-3)
    assert jnp.allclose(attn_w, ref_attn, atol=5e-3, rtol=5e-3)

    print("KERNEL_OK")
</pallas_src>

<mosaic_0001>
module attributes {stable_mosaic.version = 11 : i64} {
  func.func @encoder_layer_kernel(%arg0: i32, %arg1: memref<2x8x32xf32, #tpu.memory_space<vmem>>, %arg2: memref<32x32xf32, #tpu.memory_space<vmem>>, %arg3: memref<32x32xf32, #tpu.memory_space<vmem>>, %arg4: memref<32x32xf32, #tpu.memory_space<vmem>>, %arg5: memref<32x32xf32, #tpu.memory_space<vmem>>, %arg6: memref<1x32xf32, #tpu.memory_space<vmem>>, %arg7: memref<1x32xf32, #tpu.memory_space<vmem>>, %arg8: memref<32x64xf32, #tpu.memory_space<vmem>>, %arg9: memref<1x64xf32, #tpu.memory_space<vmem>>, %arg10: memref<64x32xf32, #tpu.memory_space<vmem>>, %arg11: memref<1x32xf32, #tpu.memory_space<vmem>>, %arg12: memref<1x32xf32, #tpu.memory_space<vmem>>, %arg13: memref<1x32xf32, #tpu.memory_space<vmem>>, %arg14: memref<2x8x32xf32, #tpu.memory_space<vmem>>, %arg15: memref<2x32x8xf32, #tpu.memory_space<vmem>>) attributes {dimension_semantics = [#tpu.dimension_semantics<parallel>], iteration_bounds = array<i64: 1>, scalar_prefetch = 0 : i64, scratch_operands = 0 : i64, tpu.core_type = #tpu.core_type<tc>, window_params = [{transform_indices = @transform_0, window_bounds = array<i64: 2, 8, 32>}, {pipeline_mode = #tpu.pipeline_mode<synchronous>, transform_indices = @transform_1, window_bounds = array<i64: 32, 32>}, {pipeline_mode = #tpu.pipeline_mode<synchronous>, transform_indices = @transform_2, window_bounds = array<i64: 32, 32>}, {pipeline_mode = #tpu.pipeline_mode<synchronous>, transform_indices = @transform_3, window_bounds = array<i64: 32, 32>}, {pipeline_mode = #tpu.pipeline_mode<synchronous>, transform_indices = @transform_4, window_bounds = array<i64: 32, 32>}, {pipeline_mode = #tpu.pipeline_mode<synchronous>, transform_indices = @transform_5, window_bounds = array<i64: 1, 32>}, {pipeline_mode = #tpu.pipeline_mode<synchronous>, transform_indices = @transform_6, window_bounds = array<i64: 1, 32>}, {pipeline_mode = #tpu.pipeline_mode<synchronous>, transform_indices = @transform_7, window_bounds = array<i64: 32, 64>}, {pipeline_mode = #tpu.pipeline_mode<synchronous>, transform_indices = @transform_8, window_bounds = array<i64: 1, 64>}, {pipeline_mode = #tpu.pipeline_mode<synchronous>, transform_indices = @transform_9, window_bounds = array<i64: 64, 32>}, {pipeline_mode = #tpu.pipeline_mode<synchronous>, transform_indices = @transform_10, window_bounds = array<i64: 1, 32>}, {pipeline_mode = #tpu.pipeline_mode<synchronous>, transform_indices = @transform_11, window_bounds = array<i64: 1, 32>}, {pipeline_mode = #tpu.pipeline_mode<synchronous>, transform_indices = @transform_12, window_bounds = array<i64: 1, 32>}, {transform_indices = @transform_13, window_bounds = array<i64: 2, 8, 32>}, {transform_indices = @transform_14, window_bounds = array<i64: 2, 32, 8>}]} {
    %c0 = arith.constant 0 : index
    %c0_0 = arith.constant 0 : index
    %c0_1 = arith.constant 0 : index
    %0 = vector.load %arg1[%c0, %c0_0, %c0_1] : memref<2x8x32xf32, #tpu.memory_space<vmem>>, vector<2x8x32xf32>
    %1 = vector.shape_cast %0 : vector<2x8x32xf32> to vector<16x32xf32>
    %cst = arith.constant 8.000000e+00 : f32
    %2 = math.sqrt %cst : f32
    %cst_2 = arith.constant 1.000000e+00 : f32
    %3 = arith.divf %cst_2, %2 : f32
    %c0_3 = arith.constant 0 : index
    %c0_4 = arith.constant 0 : index
    %4 = vector.load %arg2[%c0_3, %c0_4] : memref<32x32xf32, #tpu.memory_space<vmem>>, vector<32x32xf32>
    %cst_5 = arith.constant dense<0.000000e+00> : vector<16x32xf32>
    %5 = tpu.matmul %1, %4, %cst_5 {dimension_numbers = #tpu.dot_dimension_numbers<[1], [0], [0], [1], [0, 0, 1, 1], [], []>} : vector<16x32xf32>, vector<32x32xf32>, vector<16x32xf32> -> vector<16x32xf32>
    %c0_6 = arith.constant 0 : index
    %c0_7 = arith.constant 0 : index
    %6 = vector.load %arg3[%c0_6, %c0_7] : memref<32x32xf32, #tpu.memory_space<vmem>>, vector<32x32xf32>
    %cst_8 = arith.constant dense<0.000000e+00> : vector<16x32xf32>
    %7 = tpu.matmul %1, %6, %cst_8 {dimension_numbers = #tpu.dot_dimension_numbers<[1], [0], [0], [1], [0, 0, 1, 1], [], []>} : vector<16x32xf32>, vector<32x32xf32>, vector<16x32xf32> -> vector<16x32xf32>
    %c0_9 = arith.constant 0 : index
    %c0_10 = arith.constant 0 : index
    %8 = vector.load %arg4[%c0_9, %c0_10] : memref<32x32xf32, #tpu.memory_space<vmem>>, vector<32x32xf32>
    %cst_11 = arith.constant dense<0.000000e+00> : vector<16x32xf32>
    %9 = tpu.matmul %1, %8, %cst_11 {dimension_numbers = #tpu.dot_dimension_numbers<[1], [0], [0], [1], [0, 0, 1, 1], [], []>} : vector<16x32xf32>, vector<32x32xf32>, vector<16x32xf32> -> vector<16x32xf32>
    %10 = vector.extract_strided_slice %5 {offsets = [0, 0], sizes = [8, 8], strides = [1, 1]} : vector<16x32xf32> to vector<8x8xf32>
    %11 = vector.extract_strided_slice %7 {offsets = [0, 0], sizes = [8, 8], strides = [1, 1]} : vector<16x32xf32> to vector<8x8xf32>
    %12 = vector.extract_strided_slice %9 {offsets = [0, 0], sizes = [8, 8], strides = [1, 1]} : vector<16x32xf32> to vector<8x8xf32>
    %cst_12 = arith.constant dense<0.000000e+00> : vector<8x8xf32>
    %13 = tpu.matmul %10, %11, %cst_12 {dimension_numbers = #tpu.dot_dimension_numbers<[1], [1], [0], [0], [0, 0, 1, 0], [], []>} : vector<8x8xf32>, vector<8x8xf32>, vector<8x8xf32> -> vector<8x8xf32>
    %14 = vector.broadcast %3 : f32 to vector<8x8xf32>
    %15 = arith.mulf %13, %14 : vector<8x8xf32>
    %cst_13 = arith.constant dense<0xFF800000> : vector<8xf32>
    %16 = vector.multi_reduction <maximumf>, %15, %cst_13 [1] : vector<8x8xf32> to vector<8xf32>
    %17 = vector.shape_cast %16 : vector<8xf32> to vector<8x1xf32>
    %18 = vector.broadcast %17 : vector<8x1xf32> to vector<8x8xf32>
    %19 = arith.subf %15, %18 : vector<8x8xf32>
    %20 = math.exp %19 : vector<8x8xf32>
    %cst_14 = arith.constant dense<0.000000e+00> : vector<8xf32>
    %21 = vector.multi_reduction <add>, %20, %cst_14 [1] : vector<8x8xf32> to vector<8xf32>
    %22 = vector.shape_cast %21 : vector<8xf32> to vector<8x1xf32>
    %23 = tpu.reciprocal %22 {approx = true} : vector<8x1xf32> -> vector<8x1xf32>
    %24 = vector.broadcast %23 : vector<8x1xf32> to vector<8x8xf32>
    %25 = arith.mulf %20, %24 : vector<8x8xf32>
    %cst_15 = arith.constant dense<0.000000e+00> : vector<8x8xf32>
    %26 = tpu.matmul %25, %12, %cst_15 {dimension_numbers = #tpu.dot_dimension_numbers<[1], [0], [0], [1], [0, 0, 1, 1], [], []>} : vector<8x8xf32>, vector<8x8xf32>, vector<8x8xf32> -> vector<8x8xf32>
    %27 = vector.extract_strided_slice %5 {offsets = [0, 8], sizes = [8, 8], strides = [1, 1]} : vector<16x32xf32> to vector<8x8xf32>
    %28 = vector.extract_strided_slice %7 {offsets = [0, 8], sizes = [8, 8], strides = [1, 1]} : vector<16x32xf32> to vector<8x8xf32>
    %29 = vector.extract_strided_slice %9 {offsets = [0, 8], sizes = [8, 8], strides = [1, 1]} : vector<16x32xf32> to vector<8x8xf32>
    %cst_16 = arith.constant dense<0.000000e+00> : vector<8x8xf32>
    %30 = tpu.matmul %27, %28, %cst_16 {dimension_numbers = #tpu.dot_dimension_numbers<[1], [1], [0], [0], [0, 0, 1, 0], [], []>} : vector<8x8xf32>, vector<8x8xf32>, vector<8x8xf32> -> vector<8x8xf32>
    %31 = vector.broadcast %3 : f32 to vector<8x8xf32>
    %32 = arith.mulf %30, %31 : vector<8x8xf32>
    %cst_17 = arith.constant dense<0xFF800000> : vector<8xf32>
    %33 = vector.multi_reduction <maximumf>, %32, %cst_17 [1] : vector<8x8xf32> to vector<8xf32>
    %34 = vector.shape_cast %33 : vector<8xf32> to vector<8x1xf32>
    %35 = vector.broadcast %34 : vector<8x1xf32> to vector<8x8xf32>
    %36 = arith.subf %32, %35 : vector<8x8xf32>
    %37 = math.exp %36 : vector<8x8xf32>
    %cst_18 = arith.constant dense<0.000000e+00> : vector<8xf32>
    %38 = vector.multi_reduction <add>, %37, %cst_18 [1] : vector<8x8xf32> to vector<8xf32>
    %39 = vector.shape_cast %38 : vector<8xf32> to vector<8x1xf32>
    %40 = tpu.reciprocal %39 {approx = true} : vector<8x1xf32> -> vector<8x1xf32>
    %41 = vector.broadcast %40 : vector<8x1xf32> to vector<8x8xf32>
    %42 = arith.mulf %37, %41 : vector<8x8xf32>
    %cst_19 = arith.constant dense<0.000000e+00> : vector<8x8xf32>
    %43 = tpu.matmul %42, %29, %cst_19 {dimension_numbers = #tpu.dot_dimension_numbers<[1], [0], [0], [1], [0, 0, 1, 1], [], []>} : vector<8x8xf32>, vector<8x8xf32>, vector<8x8xf32> -> vector<8x8xf32>
    %44 = vector.extract_strided_slice %5 {offsets = [0, 16], sizes = [8, 8], strides = [1, 1]} : vector<16x32xf32> to vector<8x8xf32>
    %45 = vector.extract_strided_slice %7 {offsets = [0, 16], sizes = [8, 8], strides = [1, 1]} : vector<16x32xf32> to vector<8x8xf32>
    %46 = vector.extract_strided_slice %9 {offsets = [0, 16], sizes = [8, 8], strides = [1, 1]} : vector<16x32xf32> to vector<8x8xf32>
    %cst_20 = arith.constant dense<0.000000e+00> : vector<8x8xf32>
    %47 = tpu.matmul %44, %45, %cst_20 {dimension_numbers = #tpu.dot_dimension_numbers<[1], [1], [0], [0], [0, 0, 1, 0], [], []>} : vector<8x8xf32>, vector<8x8xf32>, vector<8x8xf32> -> vector<8x8xf32>
    %48 = vector.broadcast %3 : f32 to vector<8x8xf32>
    %49 = arith.mulf %47, %48 : vector<8x8xf32>
    %cst_21 = arith.constant dense<0xFF800000> : vector<8xf32>
    %50 = vector.multi_reduction <maximumf>, %49, %cst_21 [1] : vector<8x8xf32> to vector<8xf32>
    %51 = vector.shape_cast %50 : vector<8xf32> to vector<8x1xf32>
    %52 = vector.broadcast %51 : vector<8x1xf32> to vector<8x8xf32>
    %53 = arith.subf %49, %52 : vector<8x8xf32>
    %54 = math.exp %53 : vector<8x8xf32>
    %cst_22 = arith.constant dense<0.000000e+00> : vector<8xf32>
    %55 = vector.multi_reduction <add>, %54, %cst_22 [1] : vector<8x8xf32> to vector<8xf32>
    %56 = vector.shape_cast %55 : vector<8xf32> to vector<8x1xf32>
    %57 = tpu.reciprocal %56 {approx = true} : vector<8x1xf32> -> vector<8x1xf32>
    %58 = vector.broadcast %57 : vector<8x1xf32> to vector<8x8xf32>
    %59 = arith.mulf %54, %58 : vector<8x8xf32>
    %cst_23 = arith.constant dense<0.000000e+00> : vector<8x8xf32>
    %60 = tpu.matmul %59, %46, %cst_23 {dimension_numbers = #tpu.dot_dimension_numbers<[1], [0], [0], [1], [0, 0, 1, 1], [], []>} : vector<8x8xf32>, vector<8x8xf32>, vector<8x8xf32> -> vector<8x8xf32>
    %61 = vector.extract_strided_slice %5 {offsets = [0, 24], sizes = [8, 8], strides = [1, 1]} : vector<16x32xf32> to vector<8x8xf32>
    %62 = vector.extract_strided_slice %7 {offsets = [0, 24], sizes = [8, 8], strides = [1, 1]} : vector<16x32xf32> to vector<8x8xf32>
    %63 = vector.extract_strided_slice %9 {offsets = [0, 24], sizes = [8, 8], strides = [1, 1]} : vector<16x32xf32> to vector<8x8xf32>
    %cst_24 = arith.constant dense<0.000000e+00> : vector<8x8xf32>
    %64 = tpu.matmul %61, %62, %cst_24 {dimension_numbers = #tpu.dot_dimension_numbers<[1], [1], [0], [0], [0, 0, 1, 0], [], []>} : vector<8x8xf32>, vector<8x8xf32>, vector<8x8xf32> -> vector<8x8xf32>
    %65 = vector.broadcast %3 : f32 to vector<8x8xf32>
    %66 = arith.mulf %64, %65 : vector<8x8xf32>
    %cst_25 = arith.constant dense<0xFF800000> : vector<8xf32>
    %67 = vector.multi_reduction <maximumf>, %66, %cst_25 [1] : vector<8x8xf32> to vector<8xf32>
    %68 = vector.shape_cast %67 : vector<8xf32> to vector<8x1xf32>
    %69 = vector.broadcast %68 : vector<8x1xf32> to vector<8x8xf32>
    %70 = arith.subf %66, %69 : vector<8x8xf32>
    %71 = math.exp %70 : vector<8x8xf32>
    %cst_26 = arith.constant dense<0.000000e+00> : vector<8xf32>
    %72 = vector.multi_reduction <add>, %71, %cst_26 [1] : vector<8x8xf32> to vector<8xf32>
    %73 = vector.shape_cast %72 : vector<8xf32> to vector<8x1xf32>
    %74 = tpu.reciprocal %73 {approx = true} : vector<8x1xf32> -> vector<8x1xf32>
    %75 = vector.broadcast %74 : vector<8x1xf32> to vector<8x8xf32>
    %76 = arith.mulf %71, %75 : vector<8x8xf32>
    %cst_27 = arith.constant dense<0.000000e+00> : vector<8x8xf32>
    %77 = tpu.matmul %76, %63, %cst_27 {dimension_numbers = #tpu.dot_dimension_numbers<[1], [0], [0], [1], [0, 0, 1, 1], [], []>} : vector<8x8xf32>, vector<8x8xf32>, vector<8x8xf32> -> vector<8x8xf32>
    %78 = tpu.concatenate %25, %42, %59, %76 in 0 : vector<8x8xf32>, vector<8x8xf32>, vector<8x8xf32>, vector<8x8xf32> -> vector<32x8xf32>
    %79 = tpu.concatenate %26, %43, %60, %77 in 1 : vector<8x8xf32>, vector<8x8xf32>, vector<8x8xf32>, vector<8x8xf32> -> vector<8x32xf32>
    %80 = vector.extract_strided_slice %5 {offsets = [8, 0], sizes = [8, 8], strides = [1, 1]} : vector<16x32xf32> to vector<8x8xf32>
    %81 = vector.extract_strided_slice %7 {offsets = [8, 0], sizes = [8, 8], strides = [1, 1]} : vector<16x32xf32> to vector<8x8xf32>
    %82 = vector.extract_strided_slice %9 {offsets = [8, 0], sizes = [8, 8], strides = [1, 1]} : vector<16x32xf32> to vector<8x8xf32>
    %cst_28 = arith.constant dense<0.000000e+00> : vector<8x8xf32>
    %83 = tpu.matmul %80, %81, %cst_28 {dimension_numbers = #tpu.dot_dimension_numbers<[1], [1], [0], [0], [0, 0, 1, 0], [], []>} : vector<8x8xf32>, vector<8x8xf32>, vector<8x8xf32> -> vector<8x8xf32>
    %84 = vector.broadcast %3 : f32 to vector<8x8xf32>
    %85 = arith.mulf %83, %84 : vector<8x8xf32>
    %cst_29 = arith.constant dense<0xFF800000> : vector<8xf32>
    %86 = vector.multi_reduction <maximumf>, %85, %cst_29 [1] : vector<8x8xf32> to vector<8xf32>
    %87 = vector.shape_cast %86 : vector<8xf32> to vector<8x1xf32>
    %88 = vector.broadcast %87 : vector<8x1xf32> to vector<8x8xf32>
    %89 = arith.subf %85, %88 : vector<8x8xf32>
    %90 = math.exp %89 : vector<8x8xf32>
    %cst_30 = arith.constant dense<0.000000e+00> : vector<8xf32>
    %91 = vector.multi_reduction <add>, %90, %cst_30 [1] : vector<8x8xf32> to vector<8xf32>
    %92 = vector.shape_cast %91 : vector<8xf32> to vector<8x1xf32>
    %93 = tpu.reciprocal %92 {approx = true} : vector<8x1xf32> -> vector<8x1xf32>
    %94 = vector.broadcast %93 : vector<8x1xf32> to vector<8x8xf32>
    %95 = arith.mulf %90, %94 : vector<8x8xf32>
    %cst_31 = arith.constant dense<0.000000e+00> : vector<8x8xf32>
    %96 = tpu.matmul %95, %82, %cst_31 {dimension_numbers = #tpu.dot_dimension_numbers<[1], [0], [0], [1], [0, 0, 1, 1], [], []>} : vector<8x8xf32>, vector<8x8xf32>, vector<8x8xf32> -> vector<8x8xf32>
    %97 = vector.extract_strided_slice %5 {offsets = [8, 8], sizes = [8, 8], strides = [1, 1]} : vector<16x32xf32> to vector<8x8xf32>
    %98 = vector.extract_strided_slice %7 {offsets = [8, 8], sizes = [8, 8], strides = [1, 1]} : vector<16x32xf32> to vector<8x8xf32>
    %99 = vector.extract_strided_slice %9 {offsets = [8, 8], sizes = [8, 8], strides = [1, 1]} : vector<16x32xf32> to vector<8x8xf32>
    %cst_32 = arith.constant dense<0.000000e+00> : vector<8x8xf32>
    %100 = tpu.matmul %97, %98, %cst_32 {dimension_numbers = #tpu.dot_dimension_numbers<[1], [1], [0], [0], [0, 0, 1, 0], [], []>} : vector<8x8xf32>, vector<8x8xf32>, vector<8x8xf32> -> vector<8x8xf32>
    %101 = vector.broadcast %3 : f32 to vector<8x8xf32>
    %102 = arith.mulf %100, %101 : vector<8x8xf32>
    %cst_33 = arith.constant dense<0xFF800000> : vector<8xf32>
    %103 = vector.multi_reduction <maximumf>, %102, %cst_33 [1] : vector<8x8xf32> to vector<8xf32>
    %104 = vector.shape_cast %103 : vector<8xf32> to vector<8x1xf32>
    %105 = vector.broadcast %104 : vector<8x1xf32> to vector<8x8xf32>
    %106 = arith.subf %102, %105 : vector<8x8xf32>
    %107 = math.exp %106 : vector<8x8xf32>
    %cst_34 = arith.constant dense<0.000000e+00> : vector<8xf32>
    %108 = vector.multi_reduction <add>, %107, %cst_34 [1] : vector<8x8xf32> to vector<8xf32>
    %109 = vector.shape_cast %108 : vector<8xf32> to vector<8x1xf32>
    %110 = tpu.reciprocal %109 {approx = true} : vector<8x1xf32> -> vector<8x1xf32>
    %111 = vector.broadcast %110 : vector<8x1xf32> to vector<8x8xf32>
    %112 = arith.mulf %107, %111 : vector<8x8xf32>
    %cst_35 = arith.constant dense<0.000000e+00> : vector<8x8xf32>
    %113 = tpu.matmul %112, %99, %cst_35 {dimension_numbers = #tpu.dot_dimension_numbers<[1], [0], [0], [1], [0, 0, 1, 1], [], []>} : vector<8x8xf32>, vector<8x8xf32>, vector<8x8xf32> -> vector<8x8xf32>
    %114 = vector.extract_strided_slice %5 {offsets = [8, 16], sizes = [8, 8], strides = [1, 1]} : vector<16x32xf32> to vector<8x8xf32>
    %115 = vector.extract_strided_slice %7 {offsets = [8, 16], sizes = [8, 8], strides = [1, 1]} : vector<16x32xf32> to vector<8x8xf32>
    %116 = vector.extract_strided_slice %9 {offsets = [8, 16], sizes = [8, 8], strides = [1, 1]} : vector<16x32xf32> to vector<8x8xf32>
    %cst_36 = arith.constant dense<0.000000e+00> : vector<8x8xf32>
    %117 = tpu.matmul %114, %115, %cst_36 {dimension_numbers = #tpu.dot_dimension_numbers<[1], [1], [0], [0], [0, 0, 1, 0], [], []>} : vector<8x8xf32>, vector<8x8xf32>, vector<8x8xf32> -> vector<8x8xf32>
    %118 = vector.broadcast %3 : f32 to vector<8x8xf32>
    %119 = arith.mulf %117, %118 : vector<8x8xf32>
    %cst_37 = arith.constant dense<0xFF800000> : vector<8xf32>
    %120 = vector.multi_reduction <maximumf>, %119, %cst_37 [1] : vector<8x8xf32> to vector<8xf32>
    %121 = vector.shape_cast %120 : vector<8xf32> to vector<8x1xf32>
    %122 = vector.broadcast %121 : vector<8x1xf32> to vector<8x8xf32>
    %123 = arith.subf %119, %122 : vector<8x8xf32>
    %124 = math.exp %123 : vector<8x8xf32>
    %cst_38 = arith.constant dense<0.000000e+00> : vector<8xf32>
    %125 = vector.multi_reduction <add>, %124, %cst_38 [1] : vector<8x8xf32> to vector<8xf32>
    %126 = vector.shape_cast %125 : vector<8xf32> to vector<8x1xf32>
    %127 = tpu.reciprocal %126 {approx = true} : vector<8x1xf32> -> vector<8x1xf32>
    %128 = vector.broadcast %127 : vector<8x1xf32> to vector<8x8xf32>
    %129 = arith.mulf %124, %128 : vector<8x8xf32>
    %cst_39 = arith.constant dense<0.000000e+00> : vector<8x8xf32>
    %130 = tpu.matmul %129, %116, %cst_39 {dimension_numbers = #tpu.dot_dimension_numbers<[1], [0], [0], [1], [0, 0, 1, 1], [], []>} : vector<8x8xf32>, vector<8x8xf32>, vector<8x8xf32> -> vector<8x8xf32>
    %131 = vector.extract_strided_slice %5 {offsets = [8, 24], sizes = [8, 8], strides = [1, 1]} : vector<16x32xf32> to vector<8x8xf32>
    %132 = vector.extract_strided_slice %7 {offsets = [8, 24], sizes = [8, 8], strides = [1, 1]} : vector<16x32xf32> to vector<8x8xf32>
    %133 = vector.extract_strided_slice %9 {offsets = [8, 24], sizes = [8, 8], strides = [1, 1]} : vector<16x32xf32> to vector<8x8xf32>
    %cst_40 = arith.constant dense<0.000000e+00> : vector<8x8xf32>
    %134 = tpu.matmul %131, %132, %cst_40 {dimension_numbers = #tpu.dot_dimension_numbers<[1], [1], [0], [0], [0, 0, 1, 0], [], []>} : vector<8x8xf32>, vector<8x8xf32>, vector<8x8xf32> -> vector<8x8xf32>
    %135 = vector.broadcast %3 : f32 to vector<8x8xf32>
    %136 = arith.mulf %134, %135 : vector<8x8xf32>
    %cst_41 = arith.constant dense<0xFF800000> : vector<8xf32>
    %137 = vector.multi_reduction <maximumf>, %136, %cst_41 [1] : vector<8x8xf32> to vector<8xf32>
    %138 = vector.shape_cast %137 : vector<8xf32> to vector<8x1xf32>
    %139 = vector.broadcast %138 : vector<8x1xf32> to vector<8x8xf32>
    %140 = arith.subf %136, %139 : vector<8x8xf32>
    %141 = math.exp %140 : vector<8x8xf32>
    %cst_42 = arith.constant dense<0.000000e+00> : vector<8xf32>
    %142 = vector.multi_reduction <add>, %141, %cst_42 [1] : vector<8x8xf32> to vector<8xf32>
    %143 = vector.shape_cast %142 : vector<8xf32> to vector<8x1xf32>
    %144 = tpu.reciprocal %143 {approx = true} : vector<8x1xf32> -> vector<8x1xf32>
    %145 = vector.broadcast %144 : vector<8x1xf32> to vector<8x8xf32>
    %146 = arith.mulf %141, %145 : vector<8x8xf32>
    %cst_43 = arith.constant dense<0.000000e+00> : vector<8x8xf32>
    %147 = tpu.matmul %146, %133, %cst_43 {dimension_numbers = #tpu.dot_dimension_numbers<[1], [0], [0], [1], [0, 0, 1, 1], [], []>} : vector<8x8xf32>, vector<8x8xf32>, vector<8x8xf32> -> vector<8x8xf32>
    %148 = tpu.concatenate %95, %112, %129, %146 in 0 : vector<8x8xf32>, vector<8x8xf32>, vector<8x8xf32>, vector<8x8xf32> -> vector<32x8xf32>
    %149 = tpu.concatenate %96, %113, %130, %147 in 1 : vector<8x8xf32>, vector<8x8xf32>, vector<8x8xf32>, vector<8x8xf32> -> vector<8x32xf32>
    %150 = tpu.concatenate %78, %148 in 0 : vector<32x8xf32>, vector<32x8xf32> -> vector<64x8xf32>
    %151 = vector.shape_cast %150 : vector<64x8xf32> to vector<2x32x8xf32>
    %c0_44 = arith.constant 0 : index
    %c0_45 = arith.constant 0 : index
    %c0_46 = arith.constant 0 : index
    %152 = vector.load %arg15[%c0_44, %c0_45, %c0_46] : memref<2x32x8xf32, #tpu.memory_space<vmem>>, vector<2x32x8xf32>
    tpu.vector_store %arg15[%c0_44, %c0_45, %c0_46], %151 {strides = array<i32>} : memref<2x32x8xf32, #tpu.memory_space<vmem>>, vector<2x32x8xf32>,
    %153 = tpu.concatenate %79, %149 in 0 : vector<8x32xf32>, vector<8x32xf32> -> vector<16x32xf32>
    %c0_47 = arith.constant 0 : index
    %c0_48 = arith.constant 0 : index
    %154 = vector.load %arg5[%c0_47, %c0_48] : memref<32x32xf32, #tpu.memory_space<vmem>>, vector<32x32xf32>
    %cst_49 = arith.constant dense<0.000000e+00> : vector<16x32xf32>
    %155 = tpu.matmul %153, %154, %cst_49 {dimension_numbers = #tpu.dot_dimension_numbers<[1], [0], [0], [1], [0, 0, 1, 1], [], []>} : vector<16x32xf32>, vector<32x32xf32>, vector<16x32xf32> -> vector<16x32xf32>
    %156 = arith.addf %155, %1 : vector<16x32xf32>
    %c0_50 = arith.constant 0 : index
    %c0_51 = arith.constant 0 : index
    %157 = vector.load %arg6[%c0_50, %c0_51] : memref<1x32xf32, #tpu.memory_space<vmem>>, vector<1x32xf32>
    %c0_52 = arith.constant 0 : index
    %c0_53 = arith.constant 0 : index
    %158 = vector.load %arg7[%c0_52, %c0_53] : memref<1x32xf32, #tpu.memory_space<vmem>>, vector<1x32xf32>
    %cst_54 = arith.constant dense<0.000000e+00> : vector<16xf32>
    %159 = vector.multi_reduction <add>, %156, %cst_54 [1] : vector<16x32xf32> to vector<16xf32>
    %160 = vector.shape_cast %159 : vector<16xf32> to vector<16x1xf32>
    %cst_55 = arith.constant 3.200000e+01 : f32
    %161 = vector.broadcast %cst_55 : f32 to vector<16x1xf32>
    %162 = arith.divf %160, %161 : vector<16x1xf32>
    %163 = vector.broadcast %162 : vector<16x1xf32> to vector<16x32xf32>
    %164 = arith.subf %156, %163 : vector<16x32xf32>
    %165 = arith.mulf %164, %164 : vector<16x32xf32>
    %cst_56 = arith.constant dense<0.000000e+00> : vector<16xf32>
    %166 = vector.multi_reduction <add>, %165, %cst_56 [1] : vector<16x32xf32> to vector<16xf32>
    %167 = vector.shape_cast %166 : vector<16xf32> to vector<16x1xf32>
    %cst_57 = arith.constant 3.200000e+01 : f32
    %168 = vector.broadcast %cst_57 : f32 to vector<16x1xf32>
    %169 = arith.divf %167, %168 : vector<16x1xf32>
    %170 = vector.broadcast %162 : vector<16x1xf32> to vector<16x32xf32>
    %171 = arith.subf %156, %170 : vector<16x32xf32>
    %cst_58 = arith.constant 9.99999997E-7 : f32
    %172 = vector.broadcast %cst_58 : f32 to vector<16x1xf32>
    %173 = arith.addf %169, %172 : vector<16x1xf32>
    %174 = math.rsqrt %173 : vector<16x1xf32>
    %175 = vector.broadcast %174 : vector<16x1xf32> to vector<16x32xf32>
    %176 = arith.mulf %171, %175 : vector<16x32xf32>
    %177 = vector.broadcast %157 : vector<1x32xf32> to vector<16x32xf32>
    %178 = arith.mulf %176, %177 : vector<16x32xf32>
    %179 = vector.broadcast %158 : vector<1x32xf32> to vector<16x32xf32>
    %180 = arith.addf %178, %179 : vector<16x32xf32>
    %c0_59 = arith.constant 0 : index
    %c0_60 = arith.constant 0 : index
    %181 = vector.load %arg8[%c0_59, %c0_60] : memref<32x64xf32, #tpu.memory_space<vmem>>, vector<32x64xf32>
    %cst_61 = arith.constant dense<0.000000e+00> : vector<16x64xf32>
    %182 = tpu.matmul %180, %181, %cst_61 {dimension_numbers = #tpu.dot_dimension_numbers<[1], [0], [0], [1], [0, 0, 1, 1], [], []>} : vector<16x32xf32>, vector<32x64xf32>, vector<16x64xf32> -> vector<16x64xf32>
    %c0_62 = arith.constant 0 : index
    %c0_63 = arith.constant 0 : index
    %183 = vector.load %arg9[%c0_62, %c0_63] : memref<1x64xf32, #tpu.memory_space<vmem>>, vector<1x64xf32>
    %184 = vector.broadcast %183 : vector<1x64xf32> to vector<16x64xf32>
    %185 = arith.addf %182, %184 : vector<16x64xf32>
    %cst_64 = arith.constant 0.000000e+00 : f32
    %186 = vector.broadcast %cst_64 : f32 to vector<16x64xf32>
    %187 = arith.maximumf %185, %186 : vector<16x64xf32>
    %c0_65 = arith.constant 0 : index
    %c0_66 = arith.constant 0 : index
    %188 = vector.load %arg10[%c0_65, %c0_66] : memref<64x32xf32, #tpu.memory_space<vmem>>, vector<64x32xf32>
    %cst_67 = arith.constant dense<0.000000e+00> : vector<16x32xf32>
    %189 = tpu.matmul %187, %188, %cst_67 {dimension_numbers = #tpu.dot_dimension_numbers<[1], [0], [0], [1], [0, 0, 1, 1], [], []>} : vector<16x64xf32>, vector<64x32xf32>, vector<16x32xf32> -> vector<16x32xf32>
    %c0_68 = arith.constant 0 : index
    %c0_69 = arith.constant 0 : index
    %190 = vector.load %arg11[%c0_68, %c0_69] : memref<1x32xf32, #tpu.memory_space<vmem>>, vector<1x32xf32>
    %191 = vector.broadcast %190 : vector<1x32xf32> to vector<16x32xf32>
    %192 = arith.addf %189, %191 : vector<16x32xf32>
    %193 = arith.addf %192, %180 : vector<16x32xf32>
    %c0_70 = arith.constant 0 : index
    %c0_71 = arith.constant 0 : index
    %194 = vector.load %arg12[%c0_70, %c0_71] : memref<1x32xf32, #tpu.memory_space<vmem>>, vector<1x32xf32>
    %c0_72 = arith.constant 0 : index
    %c0_73 = arith.constant 0 : index
    %195 = vector.load %arg13[%c0_72, %c0_73] : memref<1x32xf32, #tpu.memory_space<vmem>>, vector<1x32xf32>
    %cst_74 = arith.constant dense<0.000000e+00> : vector<16xf32>
    %196 = vector.multi_reduction <add>, %193, %cst_74 [1] : vector<16x32xf32> to vector<16xf32>
    %197 = vector.shape_cast %196 : vector<16xf32> to vector<16x1xf32>
    %cst_75 = arith.constant 3.200000e+01 : f32
    %198 = vector.broadcast %cst_75 : f32 to vector<16x1xf32>
    %199 = arith.divf %197, %198 : vector<16x1xf32>
    %200 = vector.broadcast %199 : vector<16x1xf32> to vector<16x32xf32>
    %201 = arith.subf %193, %200 : vector<16x32xf32>
    %202 = arith.mulf %201, %201 : vector<16x32xf32>
    %cst_76 = arith.constant dense<0.000000e+00> : vector<16xf32>
    %203 = vector.multi_reduction <add>, %202, %cst_76 [1] : vector<16x32xf32> to vector<16xf32>
    %204 = vector.shape_cast %203 : vector<16xf32> to vector<16x1xf32>
    %cst_77 = arith.constant 3.200000e+01 : f32
    %205 = vector.broadcast %cst_77 : f32 to vector<16x1xf32>
    %206 = arith.divf %204, %205 : vector<16x1xf32>
    %207 = vector.broadcast %199 : vector<16x1xf32> to vector<16x32xf32>
    %208 = arith.subf %193, %207 : vector<16x32xf32>
    %cst_78 = arith.constant 9.99999997E-7 : f32
    %209 = vector.broadcast %cst_78 : f32 to vector<16x1xf32>
    %210 = arith.addf %206, %209 : vector<16x1xf32>
    %211 = math.rsqrt %210 : vector<16x1xf32>
    %212 = vector.broadcast %211 : vector<16x1xf32> to vector<16x32xf32>
    %213 = arith.mulf %208, %212 : vector<16x32xf32>
    %214 = vector.broadcast %194 : vector<1x32xf32> to vector<16x32xf32>
    %215 = arith.mulf %213, %214 : vector<16x32xf32>
    %216 = vector.broadcast %195 : vector<1x32xf32> to vector<16x32xf32>
    %217 = arith.addf %215, %216 : vector<16x32xf32>
    %218 = vector.shape_cast %217 : vector<16x32xf32> to vector<2x8x32xf32>
    %c0_79 = arith.constant 0 : index
    %c0_80 = arith.constant 0 : index
    %c0_81 = arith.constant 0 : index
    %219 = vector.load %arg14[%c0_79, %c0_80, %c0_81] : memref<2x8x32xf32, #tpu.memory_space<vmem>>, vector<2x8x32xf32>
    tpu.vector_store %arg14[%c0_79, %c0_80, %c0_81], %218 {strides = array<i32>} : memref<2x8x32xf32, #tpu.memory_space<vmem>>, vector<2x8x32xf32>,
    return
  }
  func.func @transform_0(%arg0: i32) -> (i32, i32, i32) {
    %c0_i32 = arith.constant 0 : i32
    %c0_i32_0 = arith.constant 0 : i32
    %c0_i32_1 = arith.constant 0 : i32
    return %arg0, %c0_i32, %c0_i32_0 : i32, i32, i32
  }
  func.func @transform_1(%arg0: i32) -> (i32, i32) {
    %c0_i32 = arith.constant 0 : i32
    %c0_i32_0 = arith.constant 0 : i32
    %c0_i32_1 = arith.constant 0 : i32
    return %c0_i32, %c0_i32_0 : i32, i32
  }
  func.func @transform_2(%arg0: i32) -> (i32, i32) {
    %c0_i32 = arith.constant 0 : i32
    %c0_i32_0 = arith.constant 0 : i32
    %c0_i32_1 = arith.constant 0 : i32
    return %c0_i32, %c0_i32_0 : i32, i32
  }
  func.func @transform_3(%arg0: i32) -> (i32, i32) {
    %c0_i32 = arith.constant 0 : i32
    %c0_i32_0 = arith.constant 0 : i32
    %c0_i32_1 = arith.constant 0 : i32
    return %c0_i32, %c0_i32_0 : i32, i32
  }
  func.func @transform_4(%arg0: i32) -> (i32, i32) {
    %c0_i32 = arith.constant 0 : i32
    %c0_i32_0 = arith.constant 0 : i32
    %c0_i32_1 = arith.constant 0 : i32
    return %c0_i32, %c0_i32_0 : i32, i32
  }
  func.func @transform_5(%arg0: i32) -> (i32, i32) {
    %c0_i32 = arith.constant 0 : i32
    %c0_i32_0 = arith.constant 0 : i32
    %c0_i32_1 = arith.constant 0 : i32
    return %c0_i32, %c0_i32_0 : i32, i32
  }
  func.func @transform_6(%arg0: i32) -> (i32, i32) {
    %c0_i32 = arith.constant 0 : i32
    %c0_i32_0 = arith.constant 0 : i32
    %c0_i32_1 = arith.constant 0 : i32
    return %c0_i32, %c0_i32_0 : i32, i32
  }
  func.func @transform_7(%arg0: i32) -> (i32, i32) {
    %c0_i32 = arith.constant 0 : i32
    %c0_i32_0 = arith.constant 0 : i32
    %c0_i32_1 = arith.constant 0 : i32
    return %c0_i32, %c0_i32_0 : i32, i32
  }
  func.func @transform_8(%arg0: i32) -> (i32, i32) {
    %c0_i32 = arith.constant 0 : i32
    %c0_i32_0 = arith.constant 0 : i32
    %c0_i32_1 = arith.constant 0 : i32
    return %c0_i32, %c0_i32_0 : i32, i32
  }
  func.func @transform_9(%arg0: i32) -> (i32, i32) {
    %c0_i32 = arith.constant 0 : i32
    %c0_i32_0 = arith.constant 0 : i32
    %c0_i32_1 = arith.constant 0 : i32
    return %c0_i32, %c0_i32_0 : i32, i32
  }
  func.func @transform_10(%arg0: i32) -> (i32, i32) {
    %c0_i32 = arith.constant 0 : i32
    %c0_i32_0 = arith.constant 0 : i32
    %c0_i32_1 = arith.constant 0 : i32
    return %c0_i32, %c0_i32_0 : i32, i32
  }
  func.func @transform_11(%arg0: i32) -> (i32, i32) {
    %c0_i32 = arith.constant 0 : i32
    %c0_i32_0 = arith.constant 0 : i32
    %c0_i32_1 = arith.constant 0 : i32
    return %c0_i32, %c0_i32_0 : i32, i32
  }
  func.func @transform_12(%arg0: i32) -> (i32, i32) {
    %c0_i32 = arith.constant 0 : i32
    %c0_i32_0 = arith.constant 0 : i32
    %c0_i32_1 = arith.constant 0 : i32
    return %c0_i32, %c0_i32_0 : i32, i32
  }
  func.func @transform_13(%arg0: i32) -> (i32, i32, i32) {
    %c0_i32 = arith.constant 0 : i32
    %c0_i32_0 = arith.constant 0 : i32
    %c0_i32_1 = arith.constant 0 : i32
    return %arg0, %c0_i32, %c0_i32_0 : i32, i32, i32
  }
  func.func @transform_14(%arg0: i32) -> (i32, i32, i32) {
    %c0_i32 = arith.constant 0 : i32
    %c0_i32_0 = arith.constant 0 : i32
    %c0_i32_1 = arith.constant 0 : i32
    return %arg0, %c0_i32, %c0_i32_0 : i32, i32, i32
  }
}

</mosaic_0001>

<bundles_post_ra>
// kernel: tpu_custom_call.1
= control target key start
LH: loop header
LB: loop body
LE: loop exit
PB: predicated region body
PF: predicated region fallthrough
CT: control target
= control target key end

     0   :  { %20 = vsyncpa [#allocation3], 0  ;;  %s1542_s0 = inlined_call_operand.hbm [shape: f32[2,8,32], index: 0, kind: input, shape index: {}]   ;;  %s1543_s1 = inlined_call_operand.vmem [shape: f32[32,32], index: 1, kind: input, shape index: {}]   ;;  %s1544_s2 = inlined_call_operand.vmem [shape: f32[32,32], index: 2, kind: input, shape index: {}]   ;;  %s1545_s3 = inlined_call_operand.vmem [shape: f32[32,32], index: 3, kind: input, shape index: {}]   ;;  %s1546_s4 = inlined_call_operand.hbm [shape: f32[32,32], index: 4, kind: input, shape index: {}]   ;;  %s1547_s5 = inlined_call_operand.vmem [shape: f32[1,32], index: 5, kind: input, shape index: {}]   ;;  %s1548_s6 = inlined_call_operand.vmem [shape: f32[1,32], index: 6, kind: input, shape index: {}]   ;;  %s1549_s7 = inlined_call_operand.hbm [shape: f32[32,64], index: 7, kind: input, shape index: {}]   ;;  %s1550_s8 = inlined_call_operand.vmem [shape: f32[1,64], index: 8, kind: input, shape index: {}]   ;;  %s1551_s9 = inlined_call_operand.vmem [shape: f32[64,32], index: 9, kind: input, shape index: {}]   ;;  %s1552_s10 = inlined_call_operand.vmem [shape: f32[1,32], index: 10, kind: input, shape index: {}]   ;;  %s1553_s11 = inlined_call_operand.vmem [shape: f32[1,32], index: 11, kind: input, shape index: {}]   ;;  %s1554_s12 = inlined_call_operand.vmem [shape: f32[1,32], index: 12, kind: input, shape index: {}]   ;;  %s1555_s13 = inlined_call_operand.hbm [shape: f32[2,8,32], index: 13, kind: output, shape index: {0}]   ;;  %s1556_s14 = inlined_call_operand.vmem [shape: f32[2,32,8], index: 14, kind: output, shape index: {1}]  }
   0x1   :  { %21 = vsyncpa [#allocation6], 0 }
   0x2   :  { %22 = vsyncpa [#allocation4], 0  ;;  %s46_s15 = sshll.u32 %s1546_s4, 4  ;;  %s1204_s16 = smov [#allocation5]   ;;  %s47_s15 = int_to_ptr.hbm [resolvable:$true] %s46_s15 }
   0x3   :  { %s48_s17 = sshll.u32 %s1204_s16, 4  ;;  %s27_s20 = sshll.u32 %s1542_s0, 4  ;;  %s49_s17 = int_to_ptr.vmem [resolvable:$true] %s48_s17  ;;  %s28_s20 = int_to_ptr.hbm [resolvable:$true] %s27_s20 }
   0x4   :  { %s1205_s21 = smov 128   ;;  %s1206_s22 = smov 8  }
   0x5   :  { %54 = dma.hbm_to_vmem [thread:$0]  %s47_s15, 512, %s49_s17, [#allocation6], %s1205_s21, %s1205_s21, %s1206_s22  }
   0x6   :  { %s1207_s23 = smov [#allocation2]   ;;  %s63_s4 = sshll.u32 %s1549_s7, 4  ;;  %s64_s4 = int_to_ptr.hbm [resolvable:$true] %s63_s4 }
   0x7   :  { %s29_s24 = sshll.u32 %s1207_s23, 4  ;;  %s1208_s0 = smov [#allocation7]   ;;  %s30_s24 = int_to_ptr.vmem [resolvable:$true] %s29_s24 }
   0x8   :  { %35 = dma.hbm_to_vmem [thread:$0]  %s28_s20, 256, %s30_s24, [#allocation3], %s1205_s21, %s1205_s21, %s1206_s22  }
   0x9   :  { %s65_s27 = sshll.u32 %s1208_s0, 4  ;;  %s66_s27 = int_to_ptr.vmem [resolvable:$true] %s65_s27 }
   0xa   :  { %71 = dma.hbm_to_vmem [thread:$0]  %s64_s4, 512, %s66_s27, [#allocation6], %s1205_s21, %s1205_s21, %s1206_s22  }
   0xb   :  { %1198 = dma.done.wait [#allocation3], 256  }
   0xc   :  { %1199 = vsyncadd [#allocation3], 4294967040 }
   0xd   :  { %1200 = dma.done.wait [#allocation6], 1024  }
   0xe   :  { %1201 = vsyncadd [#allocation6], 4294966272  ;;  %v133_v0 = vld [vmem:[%s1544_s2 + $0x18] sm:$0xff]  ;;  %v132_v1 = vld [vmem:[%s1544_s2 + $0x10] sm:$0xff]  ;;  %vm100_vm0 = vcmask 261120   ;;  %vm184_vm1 = vcmask 64512  }
   0xf   :  { %v99_v2 = vld [vmem:[%s1543_s1 + $0x18] sm:$0xff]  ;;  %146 = vmatpush.msra.mxu1 %v133_v0  ;;  %v98_v3 = vld [vmem:[%s1543_s1 + $0x10] sm:$0xff]  ;;  %v131_v4 = vld [vmem:[%s1544_s2 + $0x8] sm:$0xff]  ;;  %s1211_s17 = smov 104   ;;  %s1212_s16 = smov 16   ;;  %vm458_vm2 = vcmask 130048  }
  0x10   :  { %119 = vmatpush.msra.mxu0 %v99_v2  ;;  %v97_v5 = vld [vmem:[%s1543_s1 + $0x8] sm:$0xff]  ;;  %v130_v6 = vld [vmem:[%s1544_s2] sm:$0xff]  ;;  %v160_v7 = vld [vmem:[%s1545_s3 + $0x18] sm:$0xff]  ;;  %vm460_vm3 = vcmask 195584   ;;  %vm892_vm11 = vcmask 523264   ;;  %s988_s19 = sshll.u32 %s1555_s13, 4  ;;  %s989_s19 = int_to_ptr.hbm [resolvable:$true] %s988_s19 }
  0x11   :  { %147 = vmatpush.msra.mxu1 %v132_v1  ;;  %v159_v8 = vld [vmem:[%s1545_s3 + $0x10] sm:$0xff]  ;;  %v1336_v9 = vld [vmem:[#allocation2] sm:$0xff]  ;;  %173 = vmatpush.msra.mxu2 %v160_v7  ;;  %v158_v11 = vld [vmem:[%s1545_s3 + $0x8] sm:$0xff] }
  0x12   :  { %120 = vmatpush.msra.mxu0 %v98_v3  ;;  %v96_v10 = vld [vmem:[%s1543_s1] sm:$0xff]  ;;  %v1353_v13 = vld [vmem:[#allocation2 + $0x8] sm:$0xff]  ;;  %s1209_s1 = smov 112  }
  0x13   :  { %148 = vmatpush.msra.mxu1 %v131_v4  ;;  %174 = vmatpush.msra.mxu2 %v159_v8  ;;  %v157_v12 = vld [vmem:[%s1545_s3] sm:$0xff]  ;;  %s1210_s3 = smov 120  }
  0x14   :  { %121 = vmatpush.msra.mxu0 %v97_v5 }
  0x15   :  { %149 = vmatpush.msra.mxu1 %v130_v6  ;;  %175 = vmatpush.msra.mxu2 %v158_v11 }
  0x16   :  { %122 = vmatpush.msra.mxu0 %v96_v10  ;;  %1008 = vmatmul.msk.f32.vlgmr.msra.gmra.mxu1 %vm100_vm0, %v1336_v9 }
  0x17   :  { %1006 = vmatmul.msk.f32.vlgmr.msra.gmra.mxu0 %vm100_vm0, %v1336_v9  ;;  %176 = vmatpush.msra.mxu2 %v157_v12 }
  0x18   :  { %1010 = vmatmul.msk.f32.vlgmr.msra.gmra.mxu2 %vm100_vm0, %v1336_v9 }
  0x1e   :  { %1009 = vmatmul.msk.f32.gmra.mxu1 %vm100_vm0, %v1353_v13 }
  0x1f   :  { %1007 = vmatmul.msk.f32.gmra.mxu0 %vm100_vm0, %v1353_v13 }
  0x20   :  { %1011 = vmatmul.msk.f32.gmra.mxu2 %vm100_vm0, %v1353_v13 }
  0x93   :  { %v151_v14 = vpop.f32.mrf.mxu1 }
  0x94   :  { %315 = vrot.lane.b32.xlu2 %v151_v14, %s1209_s1  ;;  %248 = vrot.lane.b32.xlu1 %v151_v14, %s1210_s3  ;;  %v124_v15 = vpop.f32.mrf.mxu0 }
  0x95   :  { %1012 = vmatpush.xpose.msk.msrb.mxu0 %vm184_vm1, %v151_v14 }
  0x98   :  { %1013 = vmatmul.msk.f32.vlgmr.msrb.gmra.mxu0 %vm184_vm1, %v124_v15 }
  0x9b   :  { %v1368_v16 = vpop.f32.mrf.mxu2  ;;  %v154_v17 = vpop.f32.mrf.mxu1 }
  0x9c   :  { %381 = vrot.lane.b32.xlu2 %v151_v14, %s1211_s17  ;;  %246 = vrot.lane.b32.xlu1 %v124_v15, %s1210_s3  ;;  %v127_v18 = vpop.f32.mrf.mxu0 }
  0x9d   :  { %241 = vmatpush.msra.mxu3 %v1368_v16 }
  0xa4   :  { %379 = vrot.lane.b32.xlu1 %v124_v15, %s1211_s17  ;;  %525 = vrot.lane.b32.xlu2 %v154_v17, %s1210_s3 }
  0xac   :  { %592 = vrot.lane.b32.xlu2 %v154_v17, %s1209_s1  ;;  %523 = vrot.lane.b32.xlu1 %v127_v18, %s1210_s3 }
  0xb4   :  { %590 = vrot.lane.b32.xlu2 %v127_v18, %s1209_s1  ;;  %658 = vrot.lane.b32.xlu1 %v154_v17, %s1211_s17 }
  0xee   :  { %v316_v19 = vpop.permute.xlu2 %315 }
  0xef   :  { %1018 = vmatpush.xpose.msk.msrb.mxu1 %vm184_vm1, %v316_v19 }
  0xf3   :  { %1024 = vmatpush.xpose.msk.msra.mxu1 %vm184_vm1, %v154_v17 }
  0xf6   :  { %v382_v26 = vpop.permute.xlu2 %381 }
  0xfe   :  { %v526_v28 = vpop.permute.xlu2 %525 }
 0x106   :  { %v249_v20 = vpop.permute.xlu1 %248  ;;  %v593_v32 = vpop.permute.xlu2 %592 }
 0x107   :  { %1015 = vmatpush.xpose.msk.msrb.mxu3 %vm184_vm1, %v249_v20 }
 0x10e   :  { %v591_v33 = vpop.permute.xlu2 %590  ;;  %v247_v34 = vpop.permute.xlu1 %246 }
 0x115   :  { %v208_v21 = vpop.f32.mrf.mxu0 }
 0x116   :  { %v211_v22 = vmul.f32 0.35355338, %v208_v21  ;;  %v380_v37 = vpop.permute.xlu1 %379 }
 0x118   :  { %v212_v23 = vsel %vm184_vm1, %v211_v22, -inf }
 0x119   :  { %213 = vmax.xlane.f32.xlu0 %v212_v23 }
 0x11e   :  { %v524_v39 = vpop.permute.xlu1 %523 }
 0x126   :  { %v659_v43 = vpop.permute.xlu1 %658 }
 0x12d   :  { %313 = vrot.lane.b32.xlu0 %v124_v15, %s1209_s1 }
 0x18c   :  { %v214_v24 = vpop.xlane.xlu0 %213 }
 0x18d   :  { %v215_v25 = vsub.f32 %v211_v22, %v214_v24 }
 0x18f   :  { %v216_v27 = vmul.f32 1.442695, %v215_v25 }
 0x191   :  { %1060 = vpow2.f32 %v216_v27 }
 0x197   :  { %v1061_v29 = vpop.eup %1060 }
 0x198   :  { %v218_v30 = vsel %vm184_vm1, %v1061_v29, 0.0 }
 0x199   :  { %219 = vadd.xlane.f32.xlu0 %v218_v30 }
 0x19f   :  { %v314_v31 = vpop.permute.xlu0 %313 }
 0x1a0   :  { %1019 = vmatmul.msk.f32.vlgmr.msrb.gmra.mxu1 %vm184_vm1, %v314_v31 }
 0x1a1   :  { %1030 = vmatpush.xpose.msk.msrb.mxu1 %vm184_vm1, %v593_v32 }
 0x1a8   :  { %1025 = vmatmul.msk.f32.vlgmr.msra.gmra.mxu1 %vm184_vm1, %v127_v18 }
 0x1ad   :  { %656 = vrot.lane.b32.xlu0 %v127_v18, %s1211_s17 }
 0x1b0   :  { %1031 = vmatmul.msk.f32.vlgmr.msrb.gmra.mxu1 %vm184_vm1, %v591_v33 }
 0x20c   :  { %v220_v35 = vpop.xlane.xlu0 %219 }
 0x20d   :  { %1062 = vrcp.f32 %v220_v35  ;;  %v181_v35 = vpop.f32.mrf.mxu2 }
 0x213   :  { %v1063_v36 = vpop.eup %1062 }
 0x214   :  { %v222_v38 = vmul.f32 %v1063_v36, %v1061_v29 }
 0x216   :  { %1014 = vmatmul.msk.f32.vlgmr.msra.gmra.mxu3 %vm184_vm1, %v222_v38  ;;  %737 = vst.msk [vmem:[%s1556_s14] sm:$0xff] %vm184_vm1, %v222_v38 }
 0x217   :  { %1021 = vmatpush.xpose.msk.msra.mxu3 %vm184_vm1, %v382_v26 }
 0x21d   :  { %v338_v40 = vpop.f32.mrf.mxu1 }
 0x21e   :  { %v341_v41 = vmul.f32 0.35355338, %v338_v40  ;;  %1016 = vmatmul.msk.f32.vlgmr.msrb.gmra.mxu3 %vm184_vm1, %v247_v34 }
 0x21f   :  { %1027 = vmatpush.xpose.msk.msrb.mxu3 %vm184_vm1, %v526_v28  ;;  %v657_v50 = vpop.permute.xlu0 %656 }
 0x220   :  { %v342_v42 = vsel %vm184_vm1, %v341_v41, -inf }
 0x221   :  { %343 = vmax.xlane.f32.xlu2 %v342_v42 }
 0x225   :  { %v485_v44 = vpop.f32.mrf.mxu1 }
 0x226   :  { %v488_v45 = vmul.f32 0.35355338, %v485_v44  ;;  %1022 = vmatmul.msk.f32.vlgmr.msra.gmra.mxu3 %vm184_vm1, %v380_v37 }
 0x227   :  { %1033 = vmatpush.xpose.msk.msra.mxu3 %vm184_vm1, %v659_v43 }
 0x228   :  { %v489_v46 = vsel %vm184_vm1, %v488_v45, -inf }
 0x229   :  { %490 = vmax.xlane.f32.xlu2 %v489_v46 }
 0x22d   :  { %v615_v47 = vpop.f32.mrf.mxu1 }
 0x22e   :  { %v1399_v48 = vmul.f32 0.35355338, %v615_v47  ;;  %1028 = vmatmul.msk.f32.vlgmr.msrb.gmra.mxu3 %vm184_vm1, %v524_v39 }
 0x230   :  { %v619_v49 = vsel %vm184_vm1, %v1399_v48, -inf }
 0x231   :  { %620 = vmax.xlane.f32.xlu0 %v619_v49 }
 0x236   :  { %1034 = vmatmul.msk.f32.vlgmr.msra.gmra.mxu3 %vm184_vm1, %v657_v50 }
 0x294   :  { %v344_v51 = vpop.xlane.xlu2 %343 }
 0x295   :  { %v345_v52 = vsub.f32 %v341_v41, %v344_v51 }
 0x297   :  { %v346_v53 = vmul.f32 1.442695, %v345_v52 }
 0x299   :  { %1064 = vpow2.f32 %v346_v53  ;;  %v1405_v54 = vpop.f32.mrf.mxu3 }
 0x29c   :  { %v491_v56 = vpop.xlane.xlu2 %490 }
 0x29d   :  { %v492_v60 = vsub.f32 %v488_v45, %v491_v56 }
 0x29f   :  { %v1065_v55 = vpop.eup %1064  ;;  %v493_v62 = vmul.f32 1.442695, %v492_v60 }
 0x2a0   :  { %v348_v57 = vsel %vm184_vm1, %v1065_v55, 0.0 }
 0x2a1   :  { %349 = vadd.xlane.f32.xlu0 %v348_v57  ;;  %v271_v58 = vpop.f32.mrf.mxu3  ;;  %1066 = vpow2.f32 %v493_v62 }
 0x2a2   :  { %v274_v59 = vmul.f32 0.35355338, %v271_v58 }
 0x2a4   :  { %v275_v61 = vsel %vm184_vm1, %v274_v59, -inf  ;;  %v621_v11 = vpop.xlane.xlu0 %620 }
 0x2a5   :  { %276 = vmax.xlane.f32.xlu1 %v275_v61  ;;  %v622_v36 = vsub.f32 %v1399_v48, %v621_v11  ;;  %v747_v11 = vld [vmem:[#allocation5 + $0x10] sm:$0xff] }
 0x2a7   :  { %v1067_v2 = vpop.eup %1066  ;;  %v623_v38 = vmul.f32 1.442695, %v622_v36 }
 0x2a8   :  { %v495_v5 = vsel %vm184_vm1, %v1067_v2, 0.0 }
 0x2a9   :  { %v404_v63 = vpop.f32.mrf.mxu3 }
 0x2aa   :  { %v407_v0 = vmul.f32 0.35355338, %v404_v63 }
 0x2ac   :  { %v408_v1 = vsel %vm184_vm1, %v407_v0, -inf }
 0x2ad   :  { %409 = vmax.xlane.f32.xlu0 %v408_v1 }
 0x2b1   :  { %v548_v3 = vpop.f32.mrf.mxu3 }
 0x2b2   :  { %v551_v4 = vmul.f32 0.35355338, %v548_v3 }
 0x2b4   :  { %v552_v6 = vsel %vm184_vm1, %v551_v4, -inf }
 0x2b5   :  { %496 = vadd.xlane.f32.xlu0 %v495_v5  ;;  %553 = vmax.xlane.f32.xlu1 %v552_v6 }
 0x2b9   :  { %v681_v7 = vpop.f32.mrf.mxu3 }
 0x2ba   :  { %v684_v8 = vmul.f32 0.35355338, %v681_v7 }
 0x2bc   :  { %v685_v10 = vsel %vm184_vm1, %v684_v8, -inf }
 0x2bd   :  { %686 = vmax.xlane.f32.xlu2 %v685_v10  ;;  %v748_v10 = vld [vmem:[#allocation5 + $0x18] sm:$0xff] }
 0x2be   :  { %767 = vmatpush.msra.mxu1 %v748_v10 }
 0x2c0   :  { %768 = vmatpush.msra.mxu1 %v747_v11  ;;  %v883_v11 = vld [vmem:[%s1551_s9 + $0x18] sm:$0xff] }
 0x2c9   :  { %419 = vrot.lane.b32.xlu0 %v1368_v16, %s1211_s17 }
 0x314   :  { %v350_v12 = vpop.xlane.xlu0 %349 }
 0x315   :  { %1068 = vrcp.f32 %v350_v12  ;;  %v746_v12 = vld [vmem:[#allocation5 + $0x8] sm:$0xff] }
 0x316   :  { %769 = vmatpush.msra.mxu1 %v746_v12 }
 0x318   :  { %v277_v14 = vpop.xlane.xlu1 %276 }
 0x319   :  { %v278_v15 = vsub.f32 %v274_v59, %v277_v14  ;;  %v745_v14 = vld [vmem:[#allocation5] sm:$0xff] }
 0x31a   :  { %770 = vmatpush.msra.mxu1 %v745_v14 }
 0x31b   :  { %v1069_v17 = vpop.eup %1068  ;;  %v279_v18 = vmul.f32 1.442695, %v278_v15 }
 0x31c   :  { %v352_v19 = vmul.f32 %v1069_v17, %v1065_v55 }
 0x31d   :  { %1070 = vpow2.f32 %v279_v18 }
 0x31e   :  { %739 = vst.msk [vmem:[%s1556_s14 + $0x10] sm:$0xff] %vm184_vm1, %v352_v19 }
 0x320   :  { %v410_v20 = vpop.xlane.xlu0 %409 }
 0x321   :  { %v411_v21 = vsub.f32 %v407_v0, %v410_v20 }
 0x323   :  { %v1071_v22 = vpop.eup %1070  ;;  %v412_v23 = vmul.f32 1.442695, %v411_v21 }
 0x324   :  { %v281_v24 = vsel %vm184_vm1, %v1071_v22, 0.0 }
 0x325   :  { %1072 = vpow2.f32 %v412_v23  ;;  %282 = vadd.xlane.f32.xlu1 %v281_v24 }
 0x328   :  { %v554_v25 = vpop.xlane.xlu1 %553  ;;  %v497_v26 = vpop.xlane.xlu0 %496 }
 0x329   :  { %v555_v27 = vsub.f32 %v551_v4, %v554_v25  ;;  %1074 = vrcp.f32 %v497_v26 }
 0x32b   :  { %v1073_v28 = vpop.eup %1072  ;;  %v556_v29 = vmul.f32 1.442695, %v555_v27 }
 0x32c   :  { %v414_v30 = vsel %vm184_vm1, %v1073_v28, 0.0 }
 0x32d   :  { %1076 = vpow2.f32 %v556_v29  ;;  %415 = vadd.xlane.f32.xlu2 %v414_v30 }
 0x32e   :  { %1078 = vpow2.f32 %v623_v38 }
 0x32f   :  { %v1075_v31 = vpop.eup %1074 }
 0x330   :  { %v499_v32 = vmul.f32 %v1075_v31, %v1067_v2  ;;  %v687_v37 = vpop.xlane.xlu2 %686 }
 0x331   :  { %v688_v39 = vsub.f32 %v684_v8, %v687_v37 }
 0x332   :  { %741 = vst.msk [vmem:[%s1556_s14 + $0x20] sm:$0xff] %vm184_vm1, %v499_v32 }
 0x333   :  { %v1077_v33 = vpop.eup %1076  ;;  %v689_v40 = vmul.f32 1.442695, %v688_v39 }
 0x334   :  { %v558_v34 = vsel %vm184_vm1, %v1077_v33, 0.0  ;;  %v1079_v41 = vpop.eup %1078 }
 0x335   :  { %559 = vadd.xlane.f32.xlu0 %v558_v34  ;;  %1080 = vpow2.f32 %v689_v40  ;;  %v625_v42 = vsel %vm184_vm1, %v1079_v41, 0.0 }
 0x33b   :  { %v420_v46 = vpop.permute.xlu0 %419 }
 0x33e   :  { %287 = vrot.lane.b32.xlu1 %v1368_v16, %s1210_s3 }
 0x345   :  { %353 = vrot.lane.b32.xlu2 %v1368_v16, %s1209_s1  ;;  %v1081_v16 = vpop.eup %1080 }
 0x346   :  { %v691_v43 = vsel %vm184_vm1, %v1081_v16, 0.0 }
 0x349   :  { %564 = vrot.lane.b32.xlu0 %v181_v35, %s1210_s3 }
 0x351   :  { %630 = vrot.lane.b32.xlu0 %v181_v35, %s1209_s1  ;;  %s1213_s1 = smov 24  }
 0x359   :  { %696 = vrot.lane.b32.xlu0 %v181_v35, %s1211_s17 }
 0x368   :  { %626 = vadd.xlane.f32.xlu1 %v625_v42 }
 0x36e   :  { %692 = vadd.xlane.f32.xlu2 %v691_v43 }
 0x398   :  { %v283_v44 = vpop.xlane.xlu1 %282 }
 0x399   :  { %1082 = vrcp.f32 %v283_v44 }
 0x39f   :  { %v1083_v45 = vpop.eup %1082 }
 0x3a0   :  { %v285_v47 = vmul.f32 %v1083_v45, %v1071_v22  ;;  %v416_v48 = vpop.xlane.xlu2 %415 }
 0x3a1   :  { %1084 = vrcp.f32 %v416_v48  ;;  %v843_v48 = vld [vmem:[#allocation7 + $0x10] sm:$0xff] }
 0x3a2   :  { %738 = vst.msk [vmem:[%s1556_s14 + $0x8] sm:$0xff] %vm184_vm1, %v285_v47 }
 0x3a7   :  { %v1085_v49 = vpop.eup %1084 }
 0x3a8   :  { %v418_v50 = vmul.f32 %v1085_v49, %v1073_v28  ;;  %v354_v51 = vpop.permute.xlu2 %353  ;;  %v560_v52 = vpop.xlane.xlu0 %559  ;;  %v842_v49 = vld [vmem:[#allocation7 + $0x8] sm:$0xff] }
 0x3a9   :  { %1086 = vrcp.f32 %v560_v52  ;;  %374 = vmatpush.msrb.mxu2 %v354_v51 }
 0x3aa   :  { %740 = vst.msk [vmem:[%s1556_s14 + $0x18] sm:$0xff] %vm184_vm1, %v418_v50  ;;  %1020 = vmatmul.msk.f32.vlgmr.msrb.gmra.mxu2 %vm184_vm1, %v352_v19 }
 0x3ab   :  { %518 = vmatpush.msra.mxu2 %v181_v35 }
 0x3af   :  { %v1087_v53 = vpop.eup %1086 }
 0x3b0   :  { %v562_v55 = vmul.f32 %v1087_v53, %v1077_v33  ;;  %v288_v56 = vpop.permute.xlu1 %287  ;;  %v1214_v33 = vmov 32.0  }
 0x3b1   :  { %308 = vmatpush.msra.mxu0 %v288_v56 }
 0x3b2   :  { %742 = vst.msk [vmem:[%s1556_s14 + $0x28] sm:$0xff] %vm184_vm1, %v562_v55  ;;  %1017 = vmatmul.msk.f32.vlgmr.msra.gmra.mxu0 %vm184_vm1, %v285_v47  ;;  %1026 = vmatmul.msk.f32.vlgmr.msra.gmra.mxu2 %vm184_vm1, %v499_v32  ;;  %v844_v47 = vld [vmem:[#allocation7 + $0x18] sm:$0xff] }
 0x3b3   :  { %440 = vmatpush.msrb.mxu0 %v420_v46 }
 0x3ba   :  { %1023 = vmatmul.msk.f32.vlgmr.msrb.gmra.mxu0 %vm184_vm1, %v418_v50  ;;  %v841_v50 = vld [vmem:[#allocation7] sm:$0xff] }
 0x3bb   :  { %v565_v57 = vpop.permute.xlu0 %564 }
 0x3bc   :  { %585 = vmatpush.msra.mxu0 %v565_v57 }
 0x3c2   :  { %1029 = vmatmul.msk.f32.vlgmr.msra.gmra.mxu0 %vm184_vm1, %v562_v55 }
 0x3c3   :  { %v631_v58 = vpop.permute.xlu0 %630 }
 0x3c4   :  { %651 = vmatpush.msrb.mxu2 %v631_v58 }
 0x3c6   :  { %867 = vmatpush.msra.mxu2 %v844_v47 }
 0x3c8   :  { %868 = vmatpush.msra.mxu2 %v843_v48 }
 0x3ca   :  { %869 = vmatpush.msra.mxu2 %v842_v49 }
 0x3cb   :  { %v697_v59 = vpop.permute.xlu0 %696 }
 0x3cc   :  { %717 = vmatpush.msrb.mxu0 %v697_v59  ;;  %870 = vmatpush.msra.mxu2 %v841_v50 }
 0x3db   :  { %v627_v60 = vpop.xlane.xlu1 %626 }
 0x3dc   :  { %1088 = vrcp.f32 %v627_v60 }
 0x3e1   :  { %v693_v61 = vpop.xlane.xlu2 %692 }
 0x3e2   :  { %v1089_v62 = vpop.eup %1088  ;;  %1090 = vrcp.f32 %v693_v61  ;;  %v1054_v61 = vld [vmem:[%s1547_s5] ss:$0 sm:$0xff] }
 0x3e3   :  { %v629_v63 = vmul.f32 %v1089_v62, %v1079_v41  ;;  %1092 = vrcp.f32 %v1214_v33  ;;  %v1057_v33 = vld [vmem:[%s1552_s10] ss:$0 sm:$0xff] }
 0x3e5   :  { %743 = vst.msk [vmem:[%s1556_s14 + $0x30] sm:$0xff] %vm184_vm1, %v629_v63  ;;  %1032 = vmatmul.msk.f32.vlgmr.msrb.gmra.mxu2 %vm184_vm1, %v629_v63 }
 0x3e8   :  { %v1091_v0 = vpop.eup %1090 }
 0x3e9   :  { %v695_v1 = vmul.f32 %v1091_v0, %v1081_v16  ;;  %v1093_v34 = vpop.eup %1092  ;;  %v1055_v0 = vld [vmem:[%s1548_s6] ss:$0 sm:$0xff] }
 0x3ea   :  { %v787_v35 = vmul.f32 32.0, %v1093_v34  ;;  %vm791_vm4 = vweird.f32 %v1093_v34 }
 0x3eb   :  { %744 = vst.msk [vmem:[%s1556_s14 + $0x38] sm:$0xff] %vm184_vm1, %v695_v1  ;;  %1035 = vmatmul.msk.f32.vlgmr.msrb.gmra.mxu0 %vm184_vm1, %v695_v1 }
 0x3ec   :  { %v788_v36 = vsub.f32 1.0, %v787_v35 }
 0x3ee   :  { %v789_v37 = vmul.f32 %v1093_v34, %v788_v36 }
 0x3f0   :  { %v790_v38 = vadd.f32 %v1093_v34, %v789_v37 }
 0x3f2   :  { %v1474_v39 = vsel %vm791_vm4, %v1093_v34, %v790_v38 }
 0x42d   :  { %v376_v2 = vpop.f32.mrf.mxu2 }
 0x42e   :  { %450 = vrot.lane.b32.xlu1 %v376_v2, %s1212_s16 }
 0x42f   :  { %v310_v3 = vpop.f32.mrf.mxu0 }
 0x430   :  { %446 = vrot.lane.b32.xlu0 %v310_v3, %s1206_s22  ;;  %v887_v3 = vld [vmem:[%s1551_s9 + $0x38] sm:$0xff] }
 0x431   :  { %907 = vmatpush.msrb.mxu3 %v887_v3 }
 0x435   :  { %v520_v6 = vpop.f32.mrf.mxu2 }
 0x437   :  { %v442_v4 = vpop.f32.mrf.mxu0 }
 0x438   :  { %454 = vrot.lane.b32.xlu0 %v442_v4, %s1213_s1  ;;  %v886_v4 = vld [vmem:[%s1551_s9 + $0x30] sm:$0xff] }
 0x439   :  { %908 = vmatpush.msrb.mxu3 %v886_v4 }
 0x43f   :  { %v587_v5 = vpop.f32.mrf.mxu0 }
 0x440   :  { %723 = vrot.lane.b32.xlu2 %v587_v5, %s1206_s22  ;;  %v885_v5 = vld [vmem:[%s1551_s9 + $0x28] sm:$0xff] }
 0x441   :  { %909 = vmatpush.msrb.mxu3 %v885_v5 }
 0x468   :  { %v653_v7 = vpop.f32.mrf.mxu2  ;;  %v719_v8 = vpop.f32.mrf.mxu0 }
 0x469   :  { %727 = vrot.lane.b32.xlu0 %v653_v7, %s1212_s16 }
 0x471   :  { %731 = vrot.lane.b32.xlu0 %v719_v8, %s1213_s1  ;;  %v884_v8 = vld [vmem:[%s1551_s9 + $0x20] sm:$0xff] }
 0x472   :  { %910 = vmatpush.msrb.mxu3 %v884_v8 }
 0x474   :  { %911 = vmatpush.msrb.mxu3 %v883_v11 }
 0x49a   :  { %v724_v23 = vpop.permute.xlu2 %723 }
 0x49b   :  { %v734_v24 = vsel %vm184_vm1, %v520_v6, %v724_v23 }
 0x4a0   :  { %v451_v18 = vpop.permute.xlu1 %450 }
 0x4a2   :  { %v447_v15 = vpop.permute.xlu0 %446 }
 0x4a3   :  { %v457_v17 = vsel %vm184_vm1, %v1405_v54, %v447_v15 }
 0x4a4   :  { %v459_v19 = vsel %vm458_vm2, %v457_v17, %v451_v18 }
 0x4aa   :  { %v455_v20 = vpop.permute.xlu0 %454 }
 0x4ab   :  { %v461_v21 = vsel %vm460_vm3, %v459_v19, %v455_v20 }
 0x4ac   :  { %1036 = vmatmul.msk.f32.vlgmr.msra.gmra.mxu1 %vm100_vm0, %v461_v21 }
 0x4db   :  { %v728_v22 = vpop.permute.xlu0 %727 }
 0x4dc   :  { %v735_v25 = vsel %vm458_vm2, %v734_v24, %v728_v22  ;;  %v882_v24 = vld [vmem:[%s1551_s9 + $0x10] sm:$0xff] }
 0x4dd   :  { %912 = vmatpush.msrb.mxu3 %v882_v24 }
 0x4e3   :  { %v732_v26 = vpop.permute.xlu0 %731 }
 0x4e4   :  { %v736_v27 = vsel %vm460_vm3, %v735_v25, %v732_v26  ;;  %v881_v25 = vld [vmem:[%s1551_s9 + $0x8] sm:$0xff]  ;;  %v880_v26 = vld [vmem:[%s1551_s9] sm:$0xff] }
 0x4e5   :  { %1037 = vmatmul.msk.f32.gmra.mxu1 %vm100_vm0, %v736_v27  ;;  %913 = vmatpush.msrb.mxu3 %v881_v25  ;;  %v1056_v27 = vld [vmem:[%s1550_s8] ss:$0 sm:$0xff] }
 0x4e7   :  { %914 = vmatpush.msrb.mxu3 %v880_v26 }
 0x529   :  { %v772_v28 = vpop.f32.mrf.mxu1 }
 0x52a   :  { %v773_v54 = vadd.f32 %v772_v28, %v1336_v9 }
 0x52c   :  { %v780_v29 = vsel %vm100_vm0, %v773_v54, 0.0 }
 0x52d   :  { %781 = vadd.xlane.f32.xlu1 %v780_v29 }
 0x562   :  { %v775_v30 = vpop.f32.mrf.mxu1 }
 0x563   :  { %v776_v31 = vadd.f32 %v775_v30, %v1353_v13 }
 0x565   :  { %v783_v32 = vsel %vm100_vm0, %v776_v31, 0.0 }
 0x566   :  { %784 = vadd.xlane.f32.xlu0 %v783_v32 }
 0x5a0   :  { %v782_v9 = vpop.xlane.xlu1 %781 }
 0x5a1   :  { %v793_v40 = vmul.f32 %v1474_v39, %v782_v9 }
 0x5a3   :  { %v795_v41 = vsub.f32 %v773_v54, %v793_v40 }
 0x5a5   :  { %v797_v42 = vmul.f32 %v795_v41, %v795_v41 }
 0x5a7   :  { %v799_v13 = vsel %vm100_vm0, %v797_v42, 0.0 }
 0x5a8   :  { %800 = vadd.xlane.f32.xlu2 %v799_v13 }
 0x5d9   :  { %v785_v16 = vpop.xlane.xlu0 %784 }
 0x5da   :  { %v794_v43 = vmul.f32 %v1474_v39, %v785_v16 }
 0x5dc   :  { %v796_v44 = vsub.f32 %v776_v31, %v794_v43 }
 0x5de   :  { %v798_v45 = vmul.f32 %v796_v44, %v796_v44 }
 0x5e0   :  { %v802_v46 = vsel %vm100_vm0, %v798_v45, 0.0 }
 0x5e1   :  { %803 = vadd.xlane.f32.xlu1 %v802_v46 }
 0x61b   :  { %v801_v51 = vpop.xlane.xlu2 %800 }
 0x61c   :  { %v805_v52 = vmul.f32 %v801_v51, %v1474_v39 }
 0x61e   :  { %v807_v53 = vadd.f32 1e-06, %v805_v52 }
 0x620   :  { %1094 = vrsqrt.f32 %v807_v53  ;;  %vm815_vm6 = vweird.f32 %v807_v53 }
 0x626   :  { %v1095_v55 = vpop.eup %1094 }
 0x627   :  { %v810_v56 = vmul.f32 %v1095_v55, %v807_v53  ;;  %vm816_vm5 = vweird.f32 %v1095_v55 }
 0x628   :  { %vm817_vm7 = vmor %vm815_vm6, %vm816_vm5 }
 0x629   :  { %v811_v57 = vmul.f32 %v1095_v55, %v810_v56 }
 0x62b   :  { %v812_v58 = vmul.f32 0.5, %v811_v57 }
 0x62d   :  { %v813_v59 = vsub.f32 1.5, %v812_v58 }
 0x62f   :  { %v814_v60 = vmul.f32 %v1095_v55, %v813_v59 }
 0x631   :  { %v818_v62 = vsel %vm817_vm7, %v1095_v55, %v814_v60  ;;  %v1058_v60 = vld [vmem:[%s1553_s11] ss:$0 sm:$0xff]  ;;  %s1215_s11 = smov [#allocation8]  }
 0x632   :  { %v829_v63 = vmul.f32 %v818_v62, %v795_v41 }
 0x634   :  { %v834_v1 = vmul.f32 %v1054_v61, %v829_v63  ;;  %v1059_v63 = vld [vmem:[%s1554_s12] ss:$0 sm:$0xff]  ;;  %s986_s12 = sshll.u32 %s1215_s11, 4  ;;  %s987_s12 = int_to_ptr.vmem [resolvable:$true] %s986_s12 }
 0x636   :  { %v839_v2 = vadd.f32 %v1055_v0, %v834_v1 }
 0x638   :  { %1038 = vmatmul.msk.f32.vlgmr.msra.gmra.mxu2 %vm100_vm0, %v839_v2 }
 0x654   :  { %v804_v6 = vpop.xlane.xlu1 %803 }
 0x655   :  { %v806_v7 = vmul.f32 %v804_v6, %v1474_v39 }
 0x657   :  { %v808_v10 = vadd.f32 1e-06, %v806_v7 }
 0x659   :  { %1096 = vrsqrt.f32 %v808_v10  ;;  %vm825_vm9 = vweird.f32 %v808_v10 }
 0x65f   :  { %v1097_v12 = vpop.eup %1096 }
 0x660   :  { %v820_v14 = vmul.f32 %v1097_v12, %v808_v10  ;;  %vm826_vm8 = vweird.f32 %v1097_v12 }
 0x661   :  { %vm827_vm10 = vmor %vm825_vm9, %vm826_vm8 }
 0x662   :  { %v821_v15 = vmul.f32 %v1097_v12, %v820_v14 }
 0x664   :  { %v822_v17 = vmul.f32 0.5, %v821_v15 }
 0x666   :  { %v823_v18 = vsub.f32 1.5, %v822_v17 }
 0x668   :  { %v824_v19 = vmul.f32 %v1097_v12, %v823_v18 }
 0x66a   :  { %v828_v20 = vsel %vm827_vm10, %v1097_v12, %v824_v19 }
 0x66b   :  { %v830_v21 = vmul.f32 %v828_v20, %v796_v44 }
 0x66d   :  { %v835_v22 = vmul.f32 %v1054_v61, %v830_v21 }
 0x66f   :  { %v840_v23 = vadd.f32 %v1055_v0, %v835_v22 }
 0x671   :  { %1039 = vmatmul.msk.f32.gmra.mxu2 %vm100_vm0, %v840_v23 }
 0x6bb   :  { %v872_v28 = vpop.f32.mrf.mxu2 }
 0x6bc   :  { %v873_v54 = vadd.f32 %v1056_v27, %v872_v28 }
 0x6be   :  { %v878_v29 = vmax.f32 %v873_v54, 0.0 }
 0x6c0   :  { %1040 = vmatmul.msk.f32.vlgmr.msrb.gmra.mxu3 %vm892_vm11, %v878_v29 }
 0x6f4   :  { %v875_v30 = vpop.f32.mrf.mxu2 }
 0x6f5   :  { %v876_v31 = vadd.f32 %v1056_v27, %v875_v30 }
 0x6f7   :  { %v879_v32 = vmax.f32 %v876_v31, 0.0 }
 0x6f9   :  { %1041 = vmatmul.msk.f32.gmra.mxu3 %vm892_vm11, %v879_v32 }
 0x743   :  { %v916_v34 = vpop.f32.mrf.mxu3 }
 0x744   :  { %v917_v35 = vadd.f32 %v1057_v33, %v916_v34 }
 0x746   :  { %v922_v36 = vadd.f32 %v917_v35, %v839_v2 }
 0x748   :  { %v926_v37 = vsel %vm100_vm0, %v922_v36, 0.0 }
 0x749   :  { %927 = vadd.xlane.f32.xlu2 %v926_v37 }
 0x77c   :  { %v919_v38 = vpop.f32.mrf.mxu3 }
 0x77d   :  { %v920_v9 = vadd.f32 %v1057_v33, %v919_v38 }
 0x77f   :  { %v923_v40 = vadd.f32 %v920_v9, %v840_v23 }
 0x781   :  { %v929_v41 = vsel %vm100_vm0, %v923_v40, 0.0 }
 0x782   :  { %930 = vadd.xlane.f32.xlu0 %v929_v41 }
 0x7bc   :  { %v928_v42 = vpop.xlane.xlu2 %927 }
 0x7bd   :  { %v932_v13 = vmul.f32 %v928_v42, %v1474_v39 }
 0x7bf   :  { %v934_v16 = vsub.f32 %v922_v36, %v932_v13 }
 0x7c1   :  { %v936_v43 = vmul.f32 %v934_v16, %v934_v16 }
 0x7c3   :  { %v938_v44 = vsel %vm100_vm0, %v936_v43, 0.0 }
 0x7c4   :  { %939 = vadd.xlane.f32.xlu1 %v938_v44 }
 0x7f5   :  { %v931_v45 = vpop.xlane.xlu0 %930 }
 0x7f6   :  { %v933_v46 = vmul.f32 %v931_v45, %v1474_v39 }
 0x7f8   :  { %v935_v47 = vsub.f32 %v923_v40, %v933_v46 }
 0x7fa   :  { %v937_v48 = vmul.f32 %v935_v47, %v935_v47 }
 0x7fc   :  { %v941_v49 = vsel %vm100_vm0, %v937_v48, 0.0 }
 0x7fd   :  { %942 = vadd.xlane.f32.xlu2 %v941_v49 }
 0x837   :  { %v940_v50 = vpop.xlane.xlu1 %939 }
 0x838   :  { %v944_v51 = vmul.f32 %v940_v50, %v1474_v39 }
 0x83a   :  { %v946_v52 = vadd.f32 1e-06, %v944_v51 }
 0x83c   :  { %1098 = vrsqrt.f32 %v946_v52  ;;  %vm954_vm13 = vweird.f32 %v946_v52 }
 0x842   :  { %v1099_v53 = vpop.eup %1098 }
 0x843   :  { %v949_v55 = vmul.f32 %v1099_v53, %v946_v52  ;;  %vm955_vm12 = vweird.f32 %v1099_v53 }
 0x844   :  { %vm956_vm14 = vmor %vm954_vm13, %vm955_vm12 }
 0x845   :  { %v950_v56 = vmul.f32 %v1099_v53, %v949_v55 }
 0x847   :  { %v951_v57 = vmul.f32 0.5, %v950_v56 }
 0x849   :  { %v952_v58 = vsub.f32 1.5, %v951_v57 }
 0x84b   :  { %v953_v59 = vmul.f32 %v1099_v53, %v952_v58 }
 0x84d   :  { %v957_v61 = vsel %vm956_vm14, %v1099_v53, %v953_v59 }
 0x84e   :  { %v968_v62 = vmul.f32 %v957_v61, %v934_v16 }
 0x850   :  { %v973_v0 = vmul.f32 %v1058_v60, %v968_v62 }
 0x852   :  { %v978_v1 = vadd.f32 %v1059_v63, %v973_v0 }
 0x854   :  { %980 = vst.msk [vmem:[#allocation8] sm:$0xff] %vm100_vm0, %v978_v1 }
 0x870   :  { %v943_v2 = vpop.xlane.xlu2 %942 }
 0x871   :  { %v945_v3 = vmul.f32 %v943_v2, %v1474_v39 }
 0x873   :  { %v947_v4 = vadd.f32 1e-06, %v945_v3 }
 0x875   :  { %1100 = vrsqrt.f32 %v947_v4  ;;  %vm964_vm1 = vweird.f32 %v947_v4 }
 0x87b   :  { %v1101_v5 = vpop.eup %1100 }
 0x87c   :  { %v959_v6 = vmul.f32 %v1101_v5, %v947_v4  ;;  %vm965_vm15 = vweird.f32 %v1101_v5 }
 0x87d   :  { %vm966_vm2 = vmor %vm964_vm1, %vm965_vm15 }
 0x87e   :  { %v960_v7 = vmul.f32 %v1101_v5, %v959_v6 }
 0x880   :  { %v961_v8 = vmul.f32 0.5, %v960_v7 }
 0x882   :  { %v962_v10 = vsub.f32 1.5, %v961_v8 }
 0x884   :  { %v963_v11 = vmul.f32 %v1101_v5, %v962_v10 }
 0x886   :  { %v967_v12 = vsel %vm966_vm2, %v1101_v5, %v963_v11 }
 0x887   :  { %v969_v14 = vmul.f32 %v967_v12, %v935_v47 }
 0x889   :  { %v974_v39 = vmul.f32 %v1058_v60, %v969_v14 }
 0x88b   :  { %v979_v15 = vadd.f32 %v1059_v63, %v974_v39 }
 0x88d   :  { %981 = vst.msk [vmem:[#allocation8 + $0x8] sm:$0xff] %vm100_vm0, %v979_v15 }
 0x88e   :  { %994 = dma.vmem_to_hbm [thread:$0]  %s987_s12, 256, %s989_s19, [#allocation4], %s1205_s21, %s1205_s21, %s1206_s22  }
 0x88f   :  { %1202 = dma.done.wait [#allocation4], 256  }
 0x890   :  { %1203 = vsyncadd [#allocation4], 4294967040 }
 0x891   :  { %1003 = vsyncpa [#allocation3], 1 }
 0x892   :  { %1004 = vsyncpa [#allocation6], 1 }
 0x893   :  { %1005 = vsyncpa [#allocation4], 1 }

</bundles_post_ra>
